<compile_context>
chip_gen: v6e
topology: v6e:2x2x1
jax: 0.10.0
libtpu: 0.0.40
codegen_flags: <defaults>
</compile_context>

<pallas_src>
import functools

import jax
import jax.numpy as jnp
import numpy as np
from jax.experimental import pallas as pl
from jax.experimental.pallas import tpu as pltpu


# ----------------------------- Pallas kernel --------------------------------
def _knowformer_v_kernel(x_ref, z_ref, a_ref, beta_ref, w1t_ref, b1_ref,
                         w2t_ref, b2_ref, g_ref, lb_ref, o_ref, *, d_true):
    # x_ref    : (B*V, DP)   node features, batch-flattened, lane-padded to DP
    # z_ref    : (B, R, DP)  per-relation modulation vectors (lane-padded)
    # a_ref    : (V, R*V)    adjacency flattened over (relation, head)
    # beta_ref : (1, DP); w1t/w2t: (DP, DP) pre-transposed; b1/b2/g/lb: (1, DP)
    # o_ref    : (B*V, DP)
    B, R, DP = z_ref.shape
    V, RV = a_ref.shape

    a = a_ref[...]                                   # (V, R*V)
    x = x_ref[...]                                   # (B*V, DP)

    # Relational message passing: one fused MXU pass per batch element.
    msgs = []
    for b in range(B):                               # B is small & static
        xb = x[b * V:(b + 1) * V, :]                 # (V, DP)
        zb = z_ref[b]                                # (R, DP)
        scaled = (zb[:, None, :] * xb[None, :, :]).reshape(RV, DP)   # (R*V, DP)
        msgs.append(jnp.dot(a, scaled, preferred_element_type=jnp.float32))
    pre = jnp.concatenate(msgs, axis=0) + beta_ref[...] * x          # (B*V, DP)

    # fc_out: Linear -> ReLU -> Linear, whole batch per MXU pass,
    # weights pre-transposed in the wrapper (no in-kernel transpose).
    h = jnp.dot(pre, w1t_ref[...], preferred_element_type=jnp.float32) + b1_ref[...]
    h = jnp.maximum(h, 0.0)
    h = jnp.dot(h, w2t_ref[...], preferred_element_type=jnp.float32) + b2_ref[...]

    # LayerNorm over the true hidden dim only (lanes >= d_true are zero pad).
    lane = jax.lax.broadcasted_iota(jnp.int32, h.shape, 1)
    mask = (lane < d_true).astype(jnp.float32)
    inv_d = 1.0 / float(d_true)
    mean = jnp.sum(h * mask, axis=-1, keepdims=True) * inv_d
    centered = (h - mean) * mask
    var = jnp.sum(centered * centered, axis=-1, keepdims=True) * inv_d
    y = centered * jax.lax.rsqrt(var + 1e-5) * g_ref[...] + lb_ref[...]

    # residual; DP % 128 == 0 -> lane-dense, unmasked store
    o_ref[...] = (y + x).astype(o_ref.dtype)


def knowformer_v_layer(x, z_rel, adj, beta, w1, b1, w2, b2, gamma, ln_b):
    B, V, D = x.shape
    R = adj.shape[0]
    DP = ((D + 127) // 128) * 128                    # lane-dense hidden dim

    pad = lambda a: jnp.pad(a, [(0, 0)] * (a.ndim - 1) + [(0, DP - D)])
    x_p = pad(x.reshape(B * V, D))                   # (B*V, DP)
    z_p = pad(z_rel)                                 # (B, R, DP)
    beta_p = pad(beta)
    w1t_p = jnp.pad(w1.T, ((0, DP - D), (0, DP - D)))
    w2t_p = jnp.pad(w2.T, ((0, DP - D), (0, DP - D)))
    b1_p, b2_p, g_p, lb_p = pad(b1), pad(b2), pad(gamma), pad(ln_b)
    # a_flat[t, r*V + h] = adj[r, t, h]  (one-time wrapper reshape)
    a_flat = jnp.transpose(adj, (1, 0, 2)).reshape(V, R * V)

    # TODO(synk): for realistic graph sizes, tile the adjacency over
    # (tail, head) blocks with a grid + VMEM f32 accumulator (or keep it in HBM
    # via pl.ANY + manual DMA) instead of holding the dense (V, R*V) slab in
    # VMEM, and cast the MXU operands to bf16 on v6e/v7x.

    vmem = pl.BlockSpec(memory_space=pltpu.MemorySpace.VMEM)
    out = pl.pallas_call(
        functools.partial(_knowformer_v_kernel, d_true=D),
        out_shape=jax.ShapeDtypeStruct((B * V, DP), jnp.float32),
        in_specs=[vmem] * 10,
        out_specs=vmem,
    )(x_p, z_p, a_flat, beta_p, w1t_p, b1_p, w2t_p, b2_p, g_p, lb_p)

    return out.reshape(B, V, DP)[:, :, :D]


# ----------------------------- plain-JAX reference ---------------------------
def reference(x, z_rel, adj, beta, w1, b1, w2, b2, gamma, ln_b):
    out = jnp.einsum('rth,bhd,brd->btd', adj, x, z_rel)
    pre = out + beta[None] * x
    h = jnp.maximum(pre @ w1.T + b1[0], 0.0)
    h = h @ w2.T + b2[0]
    mean = h.mean(-1, keepdims=True)
    var = ((h - mean) ** 2).mean(-1, keepdims=True)
    y = (h - mean) / jnp.sqrt(var + 1e-5) * gamma[0] + ln_b[0]
    return y + x


# --------------------------------- driver ------------------------------------
if __name__ == "__main__":
    B, V, D, R, E = 2, 16, 32, 4, 64

    key = jax.random.PRNGKey(0)
    ks = jax.random.split(key, 10)

    # inputs
    x = jax.random.normal(ks[0], (B, V, D), jnp.float32)
    z = jax.random.normal(ks[1], (B, D), jnp.float32)

    # deterministic edge list (head, relation, tail); graph_mask=None case
    heads = jnp.arange(E, dtype=jnp.int32) % V
    tails = (jnp.arange(E, dtype=jnp.int32) * 3 + 1) % V
    rels = jnp.arange(E, dtype=jnp.int32) % R
    # dense relation adjacency: A[r, tail, head] += 1  (edge weight = 1.0)
    adj = jnp.zeros((R, V, V), jnp.float32).at[rels, tails, heads].add(1.0)

    # parameters (deterministic synthetic init; shapes match the nn.Module)
    wz = 0.1 * jax.random.normal(ks[2], (R * D, D), jnp.float32)   # fc_z weight
    bz = 0.1 * jax.random.normal(ks[3], (R * D,), jnp.float32)     # fc_z bias
    w1 = 0.1 * jax.random.normal(ks[4], (D, D), jnp.float32)       # fc_out[0]
    b1 = 0.1 * jax.random.normal(ks[5], (1, D), jnp.float32)
    w2 = 0.1 * jax.random.normal(ks[6], (D, D), jnp.float32)       # fc_out[2]
    b2 = 0.1 * jax.random.normal(ks[7], (1, D), jnp.float32)
    beta = jax.random.normal(ks[8], (1, D), jnp.float32)           # self.beta
    gamma = jnp.ones((1, D), jnp.float32)                          # LayerNorm weight
    ln_b = jnp.zeros((1, D), jnp.float32)                          # LayerNorm bias
    # NOTE: fc_pna, fc_readout_i, fc_readout_o and self.eps exist in __init__
    # but are unused in forward(), so they are not materialized here.

    # glue: fc_z projection + rearrange 'b (r d) -> b r d'
    z_rel = (z @ wz.T + bz).reshape(B, R, D)

    out = knowformer_v_layer(x, z_rel, adj, beta, w1, b1, w2, b2, gamma, ln_b)
    out = jax.block_until_ready(out)

    ref = reference(x, z_rel, adj, beta, w1, b1, w2, b2, gamma, ln_b)
    np.testing.assert_allclose(np.asarray(out), np.asarray(ref), rtol=1e-4, atol=1e-4)

    print("KERNEL_OK")
</pallas_src>

<mosaic_0001>
module attributes {stable_mosaic.version = 11 : i64} {
  func.func @_knowformer_v_kernel(%arg0: memref<32x128xf32, #tpu.memory_space<vmem>>, %arg1: memref<2x4x128xf32, #tpu.memory_space<vmem>>, %arg2: memref<16x64xf32, #tpu.memory_space<vmem>>, %arg3: memref<1x128xf32, #tpu.memory_space<vmem>>, %arg4: memref<128x128xf32, #tpu.memory_space<vmem>>, %arg5: memref<1x128xf32, #tpu.memory_space<vmem>>, %arg6: memref<128x128xf32, #tpu.memory_space<vmem>>, %arg7: memref<1x128xf32, #tpu.memory_space<vmem>>, %arg8: memref<1x128xf32, #tpu.memory_space<vmem>>, %arg9: memref<1x128xf32, #tpu.memory_space<vmem>>, %arg10: memref<32x128xf32, #tpu.memory_space<vmem>>) attributes {dimension_semantics = [], scalar_prefetch = 0 : i64, scratch_operands = 0 : i64, tpu.core_type = #tpu.core_type<tc>} {
    %c0 = arith.constant 0 : index
    %c0_0 = arith.constant 0 : index
    %0 = vector.load %arg2[%c0, %c0_0] : memref<16x64xf32, #tpu.memory_space<vmem>>, vector<16x64xf32>
    %c0_1 = arith.constant 0 : index
    %c0_2 = arith.constant 0 : index
    %1 = vector.load %arg0[%c0_1, %c0_2] : memref<32x128xf32, #tpu.memory_space<vmem>>, vector<32x128xf32>
    %2 = vector.extract_strided_slice %1 {offsets = [0, 0], sizes = [16, 128], strides = [1, 1]} : vector<32x128xf32> to vector<16x128xf32>
    %c0_3 = arith.constant 0 : index
    %c0_4 = arith.constant 0 : index
    %c0_5 = arith.constant 0 : index
    %3 = vector.load %arg1[%c0_3, %c0_4, %c0_5] : memref<2x4x128xf32, #tpu.memory_space<vmem>>, vector<1x4x128xf32>
    %4 = vector.shape_cast %3 : vector<1x4x128xf32> to vector<4x128xf32>
    %5 = vector.shape_cast %4 : vector<4x128xf32> to vector<4x1x128xf32>
    %6 = vector.shape_cast %2 : vector<16x128xf32> to vector<1x16x128xf32>
    %7 = vector.broadcast %5 : vector<4x1x128xf32> to vector<4x16x128xf32>
    %8 = vector.broadcast %6 : vector<1x16x128xf32> to vector<4x16x128xf32>
    %9 = arith.mulf %7, %8 : vector<4x16x128xf32>
    %10 = vector.shape_cast %9 : vector<4x16x128xf32> to vector<64x128xf32>
    %cst = arith.constant dense<0.000000e+00> : vector<16x128xf32>
    %11 = tpu.matmul %0, %10, %cst {dimension_numbers = #tpu.dot_dimension_numbers<[1], [0], [0], [1], [0, 0, 1, 1], [], []>} : vector<16x64xf32>, vector<64x128xf32>, vector<16x128xf32> -> vector<16x128xf32>
    %12 = vector.extract_strided_slice %1 {offsets = [16, 0], sizes = [16, 128], strides = [1, 1]} : vector<32x128xf32> to vector<16x128xf32>
    %c1 = arith.constant 1 : index
    %c0_6 = arith.constant 0 : index
    %c0_7 = arith.constant 0 : index
    %13 = vector.load %arg1[%c1, %c0_6, %c0_7] : memref<2x4x128xf32, #tpu.memory_space<vmem>>, vector<1x4x128xf32>
    %14 = vector.shape_cast %13 : vector<1x4x128xf32> to vector<4x128xf32>
    %15 = vector.shape_cast %14 : vector<4x128xf32> to vector<4x1x128xf32>
    %16 = vector.shape_cast %12 : vector<16x128xf32> to vector<1x16x128xf32>
    %17 = vector.broadcast %15 : vector<4x1x128xf32> to vector<4x16x128xf32>
    %18 = vector.broadcast %16 : vector<1x16x128xf32> to vector<4x16x128xf32>
    %19 = arith.mulf %17, %18 : vector<4x16x128xf32>
    %20 = vector.shape_cast %19 : vector<4x16x128xf32> to vector<64x128xf32>
    %cst_8 = arith.constant dense<0.000000e+00> : vector<16x128xf32>
    %21 = tpu.matmul %0, %20, %cst_8 {dimension_numbers = #tpu.dot_dimension_numbers<[1], [0], [0], [1], [0, 0, 1, 1], [], []>} : vector<16x64xf32>, vector<64x128xf32>, vector<16x128xf32> -> vector<16x128xf32>
    %22 = tpu.concatenate %11, %21 in 0 : vector<16x128xf32>, vector<16x128xf32> -> vector<32x128xf32>
    %c0_9 = arith.constant 0 : index
    %c0_10 = arith.constant 0 : index
    %23 = vector.load %arg3[%c0_9, %c0_10] : memref<1x128xf32, #tpu.memory_space<vmem>>, vector<1x128xf32>
    %24 = vector.broadcast %23 : vector<1x128xf32> to vector<32x128xf32>
    %25 = arith.mulf %24, %1 : vector<32x128xf32>
    %26 = arith.addf %22, %25 : vector<32x128xf32>
    %c0_11 = arith.constant 0 : index
    %c0_12 = arith.constant 0 : index
    %27 = vector.load %arg4[%c0_11, %c0_12] : memref<128x128xf32, #tpu.memory_space<vmem>>, vector<128x128xf32>
    %cst_13 = arith.constant dense<0.000000e+00> : vector<32x128xf32>
    %28 = tpu.matmul %26, %27, %cst_13 {dimension_numbers = #tpu.dot_dimension_numbers<[1], [0], [0], [1], [0, 0, 1, 1], [], []>} : vector<32x128xf32>, vector<128x128xf32>, vector<32x128xf32> -> vector<32x128xf32>
    %c0_14 = arith.constant 0 : index
    %c0_15 = arith.constant 0 : index
    %29 = vector.load %arg5[%c0_14, %c0_15] : memref<1x128xf32, #tpu.memory_space<vmem>>, vector<1x128xf32>
    %30 = vector.broadcast %29 : vector<1x128xf32> to vector<32x128xf32>
    %31 = arith.addf %28, %30 : vector<32x128xf32>
    %cst_16 = arith.constant 0.000000e+00 : f32
    %32 = vector.broadcast %cst_16 : f32 to vector<32x128xf32>
    %33 = arith.maximumf %31, %32 : vector<32x128xf32>
    %c0_17 = arith.constant 0 : index
    %c0_18 = arith.constant 0 : index
    %34 = vector.load %arg6[%c0_17, %c0_18] : memref<128x128xf32, #tpu.memory_space<vmem>>, vector<128x128xf32>
    %cst_19 = arith.constant dense<0.000000e+00> : vector<32x128xf32>
    %35 = tpu.matmul %33, %34, %cst_19 {dimension_numbers = #tpu.dot_dimension_numbers<[1], [0], [0], [1], [0, 0, 1, 1], [], []>} : vector<32x128xf32>, vector<128x128xf32>, vector<32x128xf32> -> vector<32x128xf32>
    %c0_20 = arith.constant 0 : index
    %c0_21 = arith.constant 0 : index
    %36 = vector.load %arg7[%c0_20, %c0_21] : memref<1x128xf32, #tpu.memory_space<vmem>>, vector<1x128xf32>
    %37 = vector.broadcast %36 : vector<1x128xf32> to vector<32x128xf32>
    %38 = arith.addf %35, %37 : vector<32x128xf32>
    %39 = tpu.iota {dimensions = array<i32: 1>} : vector<32x128xi32>
    %c32_i32 = arith.constant 32 : i32
    %40 = vector.broadcast %c32_i32 : i32 to vector<32x128xi32>
    %41 = arith.cmpi slt, %39, %40 : vector<32x128xi32>
    %42 = arith.extui %41 : vector<32x128xi1> to vector<32x128xi32>
    %43 = arith.sitofp %42 : vector<32x128xi32> to vector<32x128xf32>
    %44 = arith.mulf %38, %43 : vector<32x128xf32>
    %cst_22 = arith.constant dense<0.000000e+00> : vector<32xf32>
    %45 = vector.multi_reduction <add>, %44, %cst_22 [1] : vector<32x128xf32> to vector<32xf32>
    %46 = vector.shape_cast %45 : vector<32xf32> to vector<32x1xf32>
    %cst_23 = arith.constant 3.125000e-02 : f32
    %47 = vector.broadcast %cst_23 : f32 to vector<32x1xf32>
    %48 = arith.mulf %46, %47 : vector<32x1xf32>
    %49 = vector.broadcast %48 : vector<32x1xf32> to vector<32x128xf32>
    %50 = arith.subf %38, %49 : vector<32x128xf32>
    %51 = arith.mulf %50, %43 : vector<32x128xf32>
    %52 = arith.mulf %51, %51 : vector<32x128xf32>
    %cst_24 = arith.constant dense<0.000000e+00> : vector<32xf32>
    %53 = vector.multi_reduction <add>, %52, %cst_24 [1] : vector<32x128xf32> to vector<32xf32>
    %54 = vector.shape_cast %53 : vector<32xf32> to vector<32x1xf32>
    %cst_25 = arith.constant 3.125000e-02 : f32
    %55 = vector.broadcast %cst_25 : f32 to vector<32x1xf32>
    %56 = arith.mulf %54, %55 : vector<32x1xf32>
    %cst_26 = arith.constant 9.99999974E-6 : f32
    %57 = vector.broadcast %cst_26 : f32 to vector<32x1xf32>
    %58 = arith.addf %56, %57 : vector<32x1xf32>
    %59 = math.rsqrt %58 : vector<32x1xf32>
    %60 = vector.broadcast %59 : vector<32x1xf32> to vector<32x128xf32>
    %61 = arith.mulf %51, %60 : vector<32x128xf32>
    %c0_27 = arith.constant 0 : index
    %c0_28 = arith.constant 0 : index
    %62 = vector.load %arg8[%c0_27, %c0_28] : memref<1x128xf32, #tpu.memory_space<vmem>>, vector<1x128xf32>
    %63 = vector.broadcast %62 : vector<1x128xf32> to vector<32x128xf32>
    %64 = arith.mulf %61, %63 : vector<32x128xf32>
    %c0_29 = arith.constant 0 : index
    %c0_30 = arith.constant 0 : index
    %65 = vector.load %arg9[%c0_29, %c0_30] : memref<1x128xf32, #tpu.memory_space<vmem>>, vector<1x128xf32>
    %66 = vector.broadcast %65 : vector<1x128xf32> to vector<32x128xf32>
    %67 = arith.addf %64, %66 : vector<32x128xf32>
    %68 = arith.addf %67, %1 : vector<32x128xf32>
    %c0_31 = arith.constant 0 : index
    %c0_32 = arith.constant 0 : index
    %69 = vector.load %arg10[%c0_31, %c0_32] : memref<32x128xf32, #tpu.memory_space<vmem>>, vector<32x128xf32>
    tpu.vector_store %arg10[%c0_31, %c0_32], %68 {strides = array<i32>} : memref<32x128xf32, #tpu.memory_space<vmem>>, vector<32x128xf32>,
    return
  }
}

</mosaic_0001>

<bundles_post_ra>
// kernel: tpu_custom_call.1
= control target key start
LH: loop header
LB: loop body
LE: loop exit
PB: predicated region body
PF: predicated region fallthrough
CT: control target
= control target key end

     0   :  { %15 = vsyncpa [#allocation3], 0  ;;  %s1204_s0 = inlined_call_operand.hbm [shape: f32[32,128], index: 0, kind: input, shape index: {}]   ;;  %s1205_s1 = inlined_call_operand.hbm [shape: f32[2,4,128], index: 1, kind: input, shape index: {}]   ;;  %s1206_s2 = inlined_call_operand.hbm [shape: f32[16,64], index: 2, kind: input, shape index: {}]   ;;  %s1207_s3 = inlined_call_operand.vmem [shape: f32[1,128], index: 3, kind: input, shape index: {}]   ;;  %s1208_s4 = inlined_call_operand.hbm [shape: f32[128,128], index: 4, kind: input, shape index: {}]   ;;  %s1209_s5 = inlined_call_operand.vmem [shape: f32[1,128], index: 5, kind: input, shape index: {}]   ;;  %s1210_s6 = inlined_call_operand.hbm [shape: f32[128,128], index: 6, kind: input, shape index: {}]   ;;  %s1211_s7 = inlined_call_operand.vmem [shape: f32[1,128], index: 7, kind: input, shape index: {}]   ;;  %s1212_s8 = inlined_call_operand.vmem [shape: f32[1,128], index: 8, kind: input, shape index: {}]   ;;  %s1213_s9 = inlined_call_operand.vmem [shape: f32[1,128], index: 9, kind: input, shape index: {}]   ;;  %s1214_s10 = inlined_call_operand.hbm [shape: f32[32,128], index: 10, kind: output, shape index: {}]  }
   0x1   :  { %16 = vsyncpa [#allocation6], 0 }
   0x2   :  { %17 = vsyncpa [#allocation9], 0 }
   0x3   :  { %18 = vsyncpa [#allocation4], 0  ;;  %s1051_s13 = smov [#allocation5]  }
   0x4   :  { %s36_s14 = sshll.u32 %s1051_s13, 4  ;;  %s37_s14 = int_to_ptr.vmem [resolvable:$true] %s36_s14 }
   0x5   :  { %s931_s15 = scalar_lea.vmem %s37_s14, 128  ;;  %p936_p1 = scmp.lt.s32.totalorder %s37_s14, %s37_s14 }
   0x6   :  { %p932_p0 = scmp.ne.s32.totalorder %s37_s14, %s931_s15  ;;  %p937_p2 = scmp.lt.s32.totalorder %s931_s15, %s931_s15 }
   0x8   :  { %p938_p3 = por %p937_p2, %p936_p1 }
   0xa   :  { %p939_p4 = pnand %p938_p3, %p932_p0 }
   0xc   :  { %942 = shalt.err (!%p939_p4)
}
   0xd   :  { %s1052_s16 = smov 64   ;;  %s1053_s17 = smov 4  }
   0xe   :  { %42 = dma.hbm_to_vmem [thread:$0]  %s1205_s1, 128, %s37_s14, [#allocation6], %s1052_s16, %s1052_s16, %s1053_s17  }
   0xf   :  { %s1054_s20 = smov [#allocation8]   ;;  %s1055_s22 = smov [#allocation2]  }
  0x10   :  { %s62_s21 = sshll.u32 %s1054_s20, 4  ;;  %s24_s23 = sshll.u32 %s1055_s22, 4  ;;  %s63_s21 = int_to_ptr.vmem [resolvable:$true] %s62_s21  ;;  %s25_s23 = int_to_ptr.vmem [resolvable:$true] %s24_s23 }
  0x11   :  { %s951_s24 = scalar_lea.vmem %s63_s21, 2048  ;;  %p956_p6 = scmp.lt.s32.totalorder %s63_s21, %s63_s21 }
  0x12   :  { %p952_p5 = scmp.ne.s32.totalorder %s63_s21, %s951_s24  ;;  %p957_p7 = scmp.lt.s32.totalorder %s951_s24, %s951_s24 }
  0x14   :  { %p958_p8 = por %p957_p7, %p956_p6 }
  0x16   :  { %p959_p9 = pnand %p958_p8, %p952_p5 }
  0x18   :  { %962 = shalt.err (!%p959_p9)
}
  0x19   :  { %s1056_s25 = smov 128   ;;  %s1057_s26 = smov 8  }
  0x1a   :  { %68 = dma.hbm_to_vmem [thread:$0]  %s1208_s4, 2048, %s63_s21, [#allocation9], %s1056_s25, %s1056_s25, %s1057_s26  }
  0x1b   :  { %s971_s1 = scalar_lea.vmem %s25_s23, 512  ;;  %p976_p11 = scmp.lt.s32.totalorder %s25_s23, %s25_s23 }
  0x1c   :  { %p972_p10 = scmp.ne.s32.totalorder %s25_s23, %s971_s1  ;;  %p977_p12 = scmp.lt.s32.totalorder %s971_s1, %s971_s1 }
  0x1e   :  { %p978_p13 = por %p977_p12, %p976_p11 }
  0x20   :  { %p979_p0 = pnand %p978_p13, %p972_p10 }
  0x22   :  { %982 = shalt.err (!%p979_p0)
}
  0x23   :  { %30 = dma.hbm_to_vmem [thread:$0]  %s1204_s0, 512, %s25_s23, [#allocation3], %s1056_s25, %s1056_s25, %s1057_s26  }
  0x24   :  { %s1058_s11 = smov [#allocation7]   ;;  %s1059_s13 = smov [#allocation10]  }
  0x25   :  { %s48_s12 = sshll.u32 %s1058_s11, 4  ;;  %s76_s4 = sshll.u32 %s1059_s13, 4  ;;  %s49_s12 = int_to_ptr.vmem [resolvable:$true] %s48_s12  ;;  %s77_s4 = int_to_ptr.vmem [resolvable:$true] %s76_s4 }
  0x26   :  { %s991_s14 = scalar_lea.vmem %s49_s12, 256  ;;  %p996_p2 = scmp.lt.s32.totalorder %s49_s12, %s49_s12 }
  0x27   :  { %p992_p1 = scmp.ne.s32.totalorder %s49_s12, %s991_s14  ;;  %p997_p3 = scmp.lt.s32.totalorder %s991_s14, %s991_s14 }
  0x29   :  { %p998_p4 = por %p997_p3, %p996_p2 }
  0x2b   :  { %p999_p5 = pnand %p998_p4, %p992_p1 }
  0x2d   :  { %1002 = shalt.err (!%p999_p5)
}
  0x2e   :  { %54 = dma.hbm_to_vmem [thread:$0]  %s1206_s2, 256, %s49_s12, [#allocation6], %s1056_s25, %s1056_s25, %s1057_s26  }
  0x2f   :  { %s1011_s0 = scalar_lea.vmem %s77_s4, 2048  ;;  %p1016_p7 = scmp.lt.s32.totalorder %s77_s4, %s77_s4 }
  0x30   :  { %p1012_p6 = scmp.ne.s32.totalorder %s77_s4, %s1011_s0  ;;  %p1017_p8 = scmp.lt.s32.totalorder %s1011_s0, %s1011_s0 }
  0x32   :  { %p1018_p9 = por %p1017_p8, %p1016_p7 }
  0x34   :  { %p1019_p10 = pnand %p1018_p9, %p1012_p6 }
  0x36   :  { %1022 = shalt.err (!%p1019_p10)
}
  0x37   :  { %82 = dma.hbm_to_vmem [thread:$0]  %s1210_s6, 2048, %s77_s4, [#allocation9], %s1056_s25, %s1056_s25, %s1057_s26  }
  0x38   :  { %1043 = dma.done.wait [#allocation3], 512  }
  0x39   :  { %1044 = vsyncadd [#allocation3], 4294966784 }
  0x3a   :  { %1045 = dma.done.wait [#allocation6], 384  }
  0x3b   :  { %1046 = vsyncadd [#allocation6], 4294966912 }
  0x3c   :  { %1047 = dma.done.wait [#allocation9], 4096  }
  0x3d   :  { %1048 = vsyncadd [#allocation9], 4294963200  ;;  %v123_v0 = vlaneseq  ;;  %v1060_v1 = vmov 1966171168   ;;  %vm164_vm0 = vcmask 523264   ;;  %v104_v12 = vld [vmem:[#allocation7] sm:$0xff] }
  0x3e   :  { %v121_v2 = vunpack.c.l.s4 %v1060_v1  ;;  %v717_v6 = vld.sshfl [vmem:[#allocation5] sm:$0x33 pattern:$0x75316420]  ;;  %805 = vmatprep.mubr.msk.f32.mxu0 %vm164_vm0, %v104_v12  ;;  %824 = vmatprep.mubr.msk.f32.mxu1 %vm164_vm0, %v104_v12  ;;  %v1148_v19 = vld [vmem:[#allocation2 + $0x8] sm:$0xff]  ;;  %v1152_v23 = vld [vmem:[#allocation2 + $0x18] sm:$0xff] }
  0x3f   :  { %v124_v3 = vshrl.u32 %v123_v0, 7  ;;  %v119_v7 = vcombine.high %v717_v6, %v717_v6  ;;  %v720_v8 = vld.sshfl [vmem:[#allocation5 + $0x4] sm:$0x33 pattern:$0x75316420]  ;;  %v1154_v25 = vld [vmem:[#allocation2 + $0x10] sm:$0xff] }
  0x40   :  { %v122_v4 = vunpack.c.0.s8 %v121_v2  ;;  %v256_v10 = vcombine.high %v720_v8, %v720_v8  ;;  %v1150_v20 = vld [vmem:[#allocation2] sm:$0xff]  ;;  %v105_v48 = vld [vmem:[#allocation7 + $0x8] sm:$0xff]  ;;  %v405_v50 = vld [vmem:[#allocation8 + $0x70] sm:$0xff] }
  0x41   :  { %v138_v14 = vsub.s32 0, %v124_v3  ;;  %v406_v49 = vld [vmem:[#allocation8 + $0x78] sm:$0xff]  ;;  %v404_v51 = vld [vmem:[#allocation8 + $0x68] sm:$0xff]  ;;  %v403_v52 = vld [vmem:[#allocation8 + $0x60] sm:$0xff] }
  0x42   :  { %v125_v5 = vsub.s32 %v122_v4, %v124_v3  ;;  %v402_v53 = vld [vmem:[#allocation8 + $0x58] sm:$0xff]  ;;  %v401_v54 = vld [vmem:[#allocation8 + $0x50] sm:$0xff]  ;;  %v400_v55 = vld [vmem:[#allocation8 + $0x48] sm:$0xff] }
  0x43   :  { %v399_v56 = vld [vmem:[#allocation8 + $0x40] sm:$0xff]  ;;  %v398_v57 = vld [vmem:[#allocation8 + $0x38] sm:$0xff]  ;;  %v397_v58 = vld [vmem:[#allocation8 + $0x30] sm:$0xff] }
  0x44   :  { %v126_v9 = vrot.slane %v717_v6, %v125_v5  ;;  %v263_v11 = vrot.slane %v720_v8, %v125_v5  ;;  %v133_v13 = vrot.slane %v119_v7, %v125_v5  ;;  %v270_v16 = vrot.slane %v256_v10, %v125_v5  ;;  %v396_v59 = vld [vmem:[#allocation8 + $0x28] sm:$0xff]  ;;  %v395_v60 = vld [vmem:[#allocation8 + $0x20] sm:$0xff]  ;;  %v394_v61 = vld [vmem:[#allocation8 + $0x18] sm:$0xff] }
  0x45   :  { %v393_v62 = vld [vmem:[#allocation8 + $0x10] sm:$0xff]  ;;  %v392_v63 = vld [vmem:[#allocation8 + $0x8] sm:$0xff]  ;;  %v391_v1 = vld [vmem:[#allocation8] sm:$0xff] }
  0x46   :  { %v134_v15 = vcombine.high %v126_v9, %v126_v9  ;;  %v271_v17 = vcombine.high %v263_v11, %v263_v11  ;;  %v135_v18 = vcombine.high %v133_v13, %v133_v13  ;;  %v272_v21 = vcombine.high %v270_v16, %v270_v16  ;;  %v518_v2 = vld [vmem:[#allocation10 + $0x78] sm:$0xff]  ;;  %v517_v3 = vld [vmem:[#allocation10 + $0x70] sm:$0xff]  ;;  %v516_v4 = vld [vmem:[#allocation10 + $0x68] sm:$0xff] }
  0x47   :  { %v143_v33 = vrot.slane %v133_v13, %v138_v14  ;;  %v280_v35 = vrot.slane %v270_v16, %v138_v14  ;;  %v139_v39 = vrot.slane %v126_v9, %v138_v14  ;;  %v276_v41 = vrot.slane %v263_v11, %v138_v14  ;;  %v515_v5 = vld [vmem:[#allocation10 + $0x60] sm:$0xff]  ;;  %v514_v6 = vld [vmem:[#allocation10 + $0x58] sm:$0xff]  ;;  %v513_v7 = vld [vmem:[#allocation10 + $0x50] sm:$0xff] }
  0x48   :  { %v151_v22 = vrot.slane %v135_v18, %v138_v14  ;;  %v147_v24 = vrot.slane %v134_v15, %v138_v14  ;;  %v288_v26 = vrot.slane %v272_v21, %v138_v14  ;;  %v284_v27 = vrot.slane %v271_v17, %v138_v14  ;;  %v512_v8 = vld [vmem:[#allocation10 + $0x48] sm:$0xff]  ;;  %v511_v9 = vld [vmem:[#allocation10 + $0x40] sm:$0xff]  ;;  %v510_v10 = vld [vmem:[#allocation10 + $0x38] sm:$0xff] }
  0x49   :  { %v159_v38 = vmul.f32 %v143_v33, %v1148_v19  ;;  %v296_v40 = vmul.f32 %v280_v35, %v1152_v23  ;;  %v158_v42 = vmul.f32 %v143_v33, %v1150_v20  ;;  %v295_v43 = vmul.f32 %v280_v35, %v1154_v25  ;;  %v509_v11 = vld [vmem:[#allocation10 + $0x30] sm:$0xff]  ;;  %v508_v12 = vld [vmem:[#allocation10 + $0x28] sm:$0xff]  ;;  %v507_v13 = vld [vmem:[#allocation10 + $0x20] sm:$0xff] }
  0x4a   :  { %v163_v28 = vmul.f32 %v151_v22, %v1148_v19  ;;  %v162_v29 = vmul.f32 %v151_v22, %v1150_v20  ;;  %v300_v30 = vmul.f32 %v288_v26, %v1152_v23  ;;  %v299_v31 = vmul.f32 %v288_v26, %v1154_v25  ;;  %v723_v14 = vld [vmem:[%s1207_s3] ss:$0 sm:$0xff] }
  0x4b   :  { %v161_v32 = vmul.f32 %v147_v24, %v1148_v19  ;;  %v298_v34 = vmul.f32 %v284_v27, %v1152_v23  ;;  %v160_v36 = vmul.f32 %v147_v24, %v1150_v20  ;;  %v297_v37 = vmul.f32 %v284_v27, %v1154_v25  ;;  %v504_v33 = vld [vmem:[#allocation10 + $0x8] sm:$0xff] }
  0x4c   :  { %789 = vmatprep.subr.mxu0 %v163_v28  ;;  %808 = vmatprep.subr.mxu1 %v300_v30  ;;  %v157_v44 = vmul.f32 %v139_v39, %v1148_v19  ;;  %v294_v45 = vmul.f32 %v276_v41, %v1152_v23  ;;  %v156_v46 = vmul.f32 %v139_v39, %v1150_v20  ;;  %v724_v35 = vld [vmem:[%s1209_s5] ss:$0 sm:$0xff] }
  0x4d   :  { %790 = vmatpush3.msra.mxu0 %v163_v28  ;;  %809 = vmatpush3.msra.mxu1 %v300_v30  ;;  %v293_v47 = vmul.f32 %v276_v41, %v1154_v25  ;;  %v383_v15 = vmul.f32 %v723_v14, %v1150_v20  ;;  %v384_v17 = vmul.f32 %v723_v14, %v1148_v19 }
  0x4e   :  { %791 = vmatprep.subr.mxu0 %v162_v29  ;;  %810 = vmatprep.subr.mxu1 %v299_v31  ;;  %v385_v18 = vmul.f32 %v723_v14, %v1154_v25  ;;  %v386_v28 = vmul.f32 %v723_v14, %v1152_v23 }
  0x4f   :  { %792 = vmatpush3.msra.mxu0 %v162_v29  ;;  %811 = vmatpush3.msra.mxu1 %v299_v31  ;;  %v506_v31 = vld [vmem:[#allocation10 + $0x18] sm:$0xff] }
  0x50   :  { %793 = vmatprep.subr.mxu0 %v161_v32  ;;  %812 = vmatprep.subr.mxu1 %v298_v34 }
  0x51   :  { %794 = vmatpush3.msra.mxu0 %v161_v32  ;;  %813 = vmatpush3.msra.mxu1 %v298_v34  ;;  %v505_v32 = vld [vmem:[#allocation10 + $0x10] sm:$0xff]  ;;  %v503_v34 = vld [vmem:[#allocation10] sm:$0xff] }
  0x52   :  { %795 = vmatprep.subr.mxu0 %v160_v36  ;;  %814 = vmatprep.subr.mxu1 %v297_v37 }
  0x53   :  { %796 = vmatpush3.msra.mxu0 %v160_v36  ;;  %815 = vmatpush3.msra.mxu1 %v297_v37 }
  0x54   :  { %797 = vmatprep.subr.mxu0 %v159_v38  ;;  %816 = vmatprep.subr.mxu1 %v296_v40 }
  0x55   :  { %798 = vmatpush3.msra.mxu0 %v159_v38  ;;  %817 = vmatpush3.msra.mxu1 %v296_v40 }
  0x56   :  { %799 = vmatprep.subr.mxu0 %v158_v42  ;;  %818 = vmatprep.subr.mxu1 %v295_v43 }
  0x57   :  { %800 = vmatpush3.msra.mxu0 %v158_v42  ;;  %819 = vmatpush3.msra.mxu1 %v295_v43 }
  0x58   :  { %801 = vmatprep.subr.mxu0 %v157_v44  ;;  %820 = vmatprep.subr.mxu1 %v294_v45 }
  0x59   :  { %802 = vmatpush3.msra.mxu0 %v157_v44  ;;  %821 = vmatpush3.msra.mxu1 %v294_v45 }
  0x5a   :  { %803 = vmatprep.subr.mxu0 %v156_v46  ;;  %822 = vmatprep.subr.mxu1 %v293_v47 }
  0x5b   :  { %804 = vmatpush3.msra.mxu0 %v156_v46  ;;  %823 = vmatpush3.msra.mxu1 %v293_v47 }
  0x5c   :  { %806 = vmatmul.mubr.msk.f32.vlgmr.msra.gmra.mxu0 %vm164_vm0, %v105_v48  ;;  %825 = vmatmul.mubr.msk.f32.vlgmr.msra.gmra.mxu1 %vm164_vm0, %v105_v48  ;;  %v612_v48 = vand.u32 127, %v123_v0 }
  0x5d   :  { %827 = vmatprep.subr.mxu0 %v406_v49  ;;  %865 = vmatprep.subr.mxu1 %v518_v2 }
  0x5e   :  { %828 = vmatpush3.msra.mxu0 %v406_v49  ;;  %866 = vmatpush3.msra.mxu1 %v518_v2  ;;  %vm613_vm1 = vcmp.lt.s32.totalorder %v612_v48, 32 }
  0x5f   :  { %829 = vmatprep.subr.mxu0 %v405_v50  ;;  %867 = vmatprep.subr.mxu1 %v517_v3 }
  0x60   :  { %830 = vmatpush3.msra.mxu0 %v405_v50  ;;  %868 = vmatpush3.msra.mxu1 %v517_v3  ;;  %v725_v50 = vld [vmem:[%s1211_s7] ss:$0 sm:$0xff] }
  0x61   :  { %831 = vmatprep.subr.mxu0 %v404_v51  ;;  %869 = vmatprep.subr.mxu1 %v516_v4 }
  0x62   :  { %832 = vmatpush3.msra.mxu0 %v404_v51  ;;  %870 = vmatpush3.msra.mxu1 %v516_v4 }
  0x63   :  { %833 = vmatprep.subr.mxu0 %v403_v52  ;;  %871 = vmatprep.subr.mxu1 %v515_v5 }
  0x64   :  { %834 = vmatpush3.msra.mxu0 %v403_v52  ;;  %872 = vmatpush3.msra.mxu1 %v515_v5 }
  0x65   :  { %835 = vmatprep.subr.mxu0 %v402_v53  ;;  %873 = vmatprep.subr.mxu1 %v514_v6 }
  0x66   :  { %836 = vmatpush3.msra.mxu0 %v402_v53  ;;  %874 = vmatpush3.msra.mxu1 %v514_v6 }
  0x67   :  { %837 = vmatprep.subr.mxu0 %v401_v54  ;;  %875 = vmatprep.subr.mxu1 %v513_v7 }
  0x68   :  { %838 = vmatpush3.msra.mxu0 %v401_v54  ;;  %876 = vmatpush3.msra.mxu1 %v513_v7  ;;  %v1061_v54 = vmov 0.0  }
  0x69   :  { %839 = vmatprep.subr.mxu0 %v400_v55  ;;  %877 = vmatprep.subr.mxu1 %v512_v8 }
  0x6a   :  { %840 = vmatpush3.msra.mxu0 %v400_v55  ;;  %878 = vmatpush3.msra.mxu1 %v512_v8  ;;  %v726_v55 = vsel %vm613_vm1, 1.0, %v1061_v54 }
  0x6b   :  { %841 = vmatprep.subr.mxu0 %v399_v56  ;;  %879 = vmatprep.subr.mxu1 %v511_v9 }
  0x6c   :  { %842 = vmatpush3.msra.mxu0 %v399_v56  ;;  %880 = vmatpush3.msra.mxu1 %v511_v9 }
  0x6d   :  { %843 = vmatprep.subr.mxu0 %v398_v57  ;;  %881 = vmatprep.subr.mxu1 %v510_v10 }
  0x6e   :  { %844 = vmatpush3.msra.mxu0 %v398_v57  ;;  %882 = vmatpush3.msra.mxu1 %v510_v10 }
  0x6f   :  { %845 = vmatprep.subr.mxu0 %v397_v58  ;;  %883 = vmatprep.subr.mxu1 %v509_v11 }
  0x70   :  { %846 = vmatpush3.msra.mxu0 %v397_v58  ;;  %884 = vmatpush3.msra.mxu1 %v509_v11 }
  0x71   :  { %847 = vmatprep.subr.mxu0 %v396_v59  ;;  %885 = vmatprep.subr.mxu1 %v508_v12 }
  0x72   :  { %848 = vmatpush3.msra.mxu0 %v396_v59  ;;  %886 = vmatpush3.msra.mxu1 %v508_v12 }
  0x73   :  { %849 = vmatprep.subr.mxu0 %v395_v60  ;;  %887 = vmatprep.subr.mxu1 %v507_v13 }
  0x74   :  { %850 = vmatpush3.msra.mxu0 %v395_v60  ;;  %888 = vmatpush3.msra.mxu1 %v507_v13 }
  0x75   :  { %851 = vmatprep.subr.mxu0 %v394_v61  ;;  %889 = vmatprep.subr.mxu1 %v506_v31 }
  0x76   :  { %852 = vmatpush3.msra.mxu0 %v394_v61  ;;  %890 = vmatpush3.msra.mxu1 %v506_v31 }
  0x77   :  { %853 = vmatprep.subr.mxu0 %v393_v62  ;;  %891 = vmatprep.subr.mxu1 %v505_v32 }
  0x78   :  { %854 = vmatpush3.msra.mxu0 %v393_v62  ;;  %892 = vmatpush3.msra.mxu1 %v505_v32 }
  0x79   :  { %855 = vmatprep.subr.mxu0 %v392_v63  ;;  %893 = vmatprep.subr.mxu1 %v504_v33 }
  0x7a   :  { %856 = vmatpush3.msra.mxu0 %v392_v63  ;;  %894 = vmatpush3.msra.mxu1 %v504_v33 }
  0x7b   :  { %857 = vmatprep.subr.mxu0 %v391_v1  ;;  %895 = vmatprep.subr.mxu1 %v503_v34 }
  0x7c   :  { %858 = vmatpush3.msra.mxu0 %v391_v1  ;;  %896 = vmatpush3.msra.mxu1 %v503_v34 }
 0x11c   :  { %v807_v16 = vpop.f32.mrf.mxu0  ;;  %v826_v21 = vpop.f32.mrf.mxu1 }
 0x11d   :  { %v388_v27 = vadd.f32 %v807_v16, %v384_v17  ;;  %v390_v30 = vadd.f32 %v826_v21, %v386_v28 }
 0x11e   :  { %v237_v22 = vpop.f32.mrf.mxu0  ;;  %v367_v26 = vpop.f32.mrf.mxu1 }
 0x11f   :  { %v387_v24 = vadd.f32 %v383_v15, %v237_v22  ;;  %v389_v29 = vadd.f32 %v385_v18, %v367_v26 }
 0x121   :  { %859 = vmatprep.mubr.f32.mxu0 %v387_v24 }
 0x122   :  { %860 = vmatmul.mubr.f32.vlgmr.msra.gmra.mxu0 %v388_v27 }
 0x123   :  { %862 = vmatprep.mubr.f32.mxu0 %v389_v29 }
 0x126   :  { %863 = vmatmul.mubr.f32.gmra.mxu0 %v390_v30 }
 0x1e2   :  { %v861_v36 = vpop.f32.mrf.mxu0 }
 0x1e3   :  { %v486_v37 = vadd.f32 %v861_v36, %v724_v35 }
 0x1e4   :  { %v480_v38 = vpop.f32.mrf.mxu0 }
 0x1e5   :  { %v481_v39 = vadd.f32 %v724_v35, %v480_v38  ;;  %v500_v42 = vmax.f32 %v486_v37, 0.0  ;;  %v727_v37 = vld [vmem:[%s1212_s8] ss:$0 sm:$0xff]  ;;  %s1062_s8 = smov [#allocation11]  }
 0x1e6   :  { %v864_v40 = vpop.f32.mrf.mxu0 }
 0x1e7   :  { %v499_v41 = vmax.f32 %v481_v39, 0.0  ;;  %v496_v43 = vadd.f32 %v864_v40, %v724_v35  ;;  %v728_v39 = vld [vmem:[%s1213_s9] ss:$0 sm:$0xff]  ;;  %s703_s9 = sshll.u32 %s1062_s8, 4  ;;  %s704_s9 = int_to_ptr.vmem [resolvable:$true] %s703_s9 }
 0x1e8   :  { %v490_v44 = vpop.f32.mrf.mxu0  ;;  %s1023_s24 = scalar_lea.vmem %s704_s9, 512  ;;  %p1028_p12 = scmp.lt.s32.totalorder %s704_s9, %s704_s9 }
 0x1e9   :  { %v491_v45 = vadd.f32 %v724_v35, %v490_v44  ;;  %897 = vmatprep.mubr.f32.mxu1 %v499_v41  ;;  %v502_v47 = vmax.f32 %v496_v43, 0.0  ;;  %p1024_p11 = scmp.ne.s32.totalorder %s704_s9, %s1023_s24  ;;  %p1029_p13 = scmp.lt.s32.totalorder %s1023_s24, %s1023_s24 }
 0x1ea   :  { %898 = vmatmul.mubr.f32.vlgmr.msra.gmra.mxu1 %v500_v42 }
 0x1eb   :  { %v501_v46 = vmax.f32 %v491_v45, 0.0  ;;  %p1030_p0 = por %p1029_p13, %p1028_p12 }
 0x1ed   :  { %900 = vmatprep.mubr.f32.mxu1 %v501_v46  ;;  %p1031_p1 = pnand %p1030_p0, %p1024_p11 }
 0x1ee   :  { %901 = vmatmul.mubr.f32.gmra.mxu1 %v502_v47 }
 0x2aa   :  { %v899_v49 = vpop.f32.mrf.mxu1 }
 0x2ab   :  { %v598_v56 = vadd.f32 %v899_v49, %v725_v50 }
 0x2ac   :  { %v592_v51 = vpop.f32.mrf.mxu1 }
 0x2ad   :  { %v593_v52 = vadd.f32 %v725_v50, %v592_v51  ;;  %v617_v62 = vmul.f32 %v726_v55, %v598_v56 }
 0x2ae   :  { %v902_v53 = vpop.f32.mrf.mxu1 }
 0x2af   :  { %v616_v57 = vmul.f32 %v726_v55, %v593_v52  ;;  %v608_v60 = vadd.f32 %v902_v53, %v725_v50 }
 0x2b0   :  { %v602_v58 = vpop.f32.mrf.mxu1 }
 0x2b1   :  { %v603_v59 = vadd.f32 %v725_v50, %v602_v58  ;;  %620 = vadd.xlane.f32.xlu0 %v616_v57  ;;  %v619_v0 = vmul.f32 %v726_v55, %v608_v60 }
 0x2b3   :  { %v618_v61 = vmul.f32 %v726_v55, %v603_v59 }
 0x2b5   :  { %624 = vadd.xlane.f32.xlu1 %v618_v61  ;;  %622 = vadd.xlane.f32.xlu0 %v617_v62 }
 0x2b9   :  { %626 = vadd.xlane.f32.xlu1 %v619_v0 }
 0x33a   :  { %v621_v63 = vpop.xlane.xlu0 %620 }
 0x33b   :  { %v628_v1 = vmul.f32 0.03125, %v621_v63 }
 0x33d   :  { %v632_v2 = vsub.f32 %v593_v52, %v628_v1 }
 0x33e   :  { %v625_v3 = vpop.xlane.xlu1 %624  ;;  %v623_v4 = vpop.xlane.xlu0 %622 }
 0x33f   :  { %v630_v5 = vmul.f32 0.03125, %v625_v3  ;;  %v629_v6 = vmul.f32 0.03125, %v623_v4  ;;  %v636_v7 = vmul.f32 %v726_v55, %v632_v2 }
 0x341   :  { %v634_v8 = vsub.f32 %v603_v59, %v630_v5  ;;  %v633_v9 = vsub.f32 %v598_v56, %v629_v6  ;;  %v640_v10 = vmul.f32 %v636_v7, %v636_v7 }
 0x342   :  { %v627_v11 = vpop.xlane.xlu1 %626 }
 0x343   :  { %v631_v12 = vmul.f32 0.03125, %v627_v11  ;;  %644 = vadd.xlane.f32.xlu0 %v640_v10  ;;  %v638_v13 = vmul.f32 %v726_v55, %v634_v8  ;;  %v637_v14 = vmul.f32 %v726_v55, %v633_v9 }
 0x345   :  { %v635_v15 = vsub.f32 %v608_v60, %v631_v12  ;;  %v642_v16 = vmul.f32 %v638_v13, %v638_v13  ;;  %v641_v17 = vmul.f32 %v637_v14, %v637_v14 }
 0x347   :  { %648 = vadd.xlane.f32.xlu0 %v642_v16  ;;  %646 = vadd.xlane.f32.xlu1 %v641_v17  ;;  %v639_v18 = vmul.f32 %v726_v55, %v635_v15 }
 0x349   :  { %v643_v21 = vmul.f32 %v639_v18, %v639_v18 }
 0x34b   :  { %650 = vadd.xlane.f32.xlu1 %v643_v21 }
 0x3cc   :  { %v645_v22 = vpop.xlane.xlu0 %644 }
 0x3cd   :  { %v652_v24 = vmul.f32 0.03125, %v645_v22 }
 0x3cf   :  { %v656_v26 = vadd.f32 1e-05, %v652_v24 }
 0x3d0   :  { %v647_v27 = vpop.xlane.xlu1 %646  ;;  %v649_v28 = vpop.xlane.xlu0 %648 }
 0x3d1   :  { %915 = vrsqrt.f32 %v656_v26  ;;  %v653_v29 = vmul.f32 0.03125, %v647_v27  ;;  %v654_v30 = vmul.f32 0.03125, %v649_v28 }
 0x3d3   :  { %v657_v31 = vadd.f32 1e-05, %v653_v29  ;;  %v658_v32 = vadd.f32 1e-05, %v654_v30 }
 0x3d4   :  { %v651_v33 = vpop.xlane.xlu1 %650 }
 0x3d5   :  { %917 = vrsqrt.f32 %v657_v31  ;;  %v655_v34 = vmul.f32 0.03125, %v651_v33 }
 0x3d6   :  { %919 = vrsqrt.f32 %v658_v32 }
 0x3d7   :  { %v659_v35 = vadd.f32 1e-05, %v655_v34 }
 0x3d9   :  { %921 = vrsqrt.f32 %v659_v35 }
 0x3de   :  { %v916_v36 = vpop.eup %915 }
 0x3df   :  { %v664_v38 = vmul.f32 %v916_v36, %v636_v7 }
 0x3e1   :  { %v675_v40 = vmul.f32 %v727_v37, %v664_v38 }
 0x3e2   :  { %v918_v41 = vpop.eup %917 }
 0x3e3   :  { %v920_v42 = vpop.eup %919  ;;  %v665_v43 = vmul.f32 %v918_v41, %v637_v14  ;;  %v686_v44 = vadd.f32 %v728_v39, %v675_v40 }
 0x3e4   :  { %v666_v45 = vmul.f32 %v920_v42, %v638_v13 }
 0x3e5   :  { %v676_v46 = vmul.f32 %v727_v37, %v665_v43  ;;  %v690_v47 = vadd.f32 %v686_v44, %v1150_v20 }
 0x3e6   :  { %v922_v48 = vpop.eup %921  ;;  %v677_v49 = vmul.f32 %v727_v37, %v666_v45 }
 0x3e7   :  { %v667_v50 = vmul.f32 %v922_v48, %v639_v18  ;;  %v687_v51 = vadd.f32 %v728_v39, %v676_v46  ;;  %694 = vst [vmem:[#allocation11] sm:$0xff] %v690_v47 }
 0x3e8   :  { %v688_v52 = vadd.f32 %v728_v39, %v677_v49 }
 0x3e9   :  { %v678_v53 = vmul.f32 %v727_v37, %v667_v50  ;;  %v691_v54 = vadd.f32 %v687_v51, %v1148_v19 }
 0x3ea   :  { %v692_v55 = vadd.f32 %v688_v52, %v1154_v25 }
 0x3eb   :  { %v689_v56 = vadd.f32 %v728_v39, %v678_v53  ;;  %695 = vst [vmem:[#allocation11 + $0x8] sm:$0xff] %v691_v54 }
 0x3ec   :  { %696 = vst [vmem:[#allocation11 + $0x10] sm:$0xff] %v692_v55 }
 0x3ed   :  { %v693_v57 = vadd.f32 %v689_v56, %v1152_v23 }
 0x3ef   :  { %697 = vst [vmem:[#allocation11 + $0x18] sm:$0xff] %v693_v57 }
 0x3f0   :  { %1034 = shalt.err (!%p1031_p1)
}
 0x3f1   :  { %709 = dma.vmem_to_hbm [thread:$0]  %s704_s9, 512, %s1214_s10, [#allocation4], %s1056_s25, %s1056_s25, %s1057_s26  }
 0x3f2   :  { %1049 = dma.done.wait [#allocation4], 512  }
 0x3f3   :  { %1050 = vsyncadd [#allocation4], 4294966784 }
 0x3f4   :  { %713 = vsyncpa [#allocation3], 1 }
 0x3f5   :  { %714 = vsyncpa [#allocation6], 1 }
 0x3f6   :  { %715 = vsyncpa [#allocation9], 1 }
 0x3f7   :  { %716 = vsyncpa [#allocation4], 1 }

</bundles_post_ra>
